<compile_context>
chip_gen: v7x
topology: tpu7x:2x2x1
jax: 0.10.0
libtpu: 0.0.40
codegen_flags: <defaults>
</compile_context>

<pallas_src>
import functools

import jax
import jax.numpy as jnp
from jax.experimental import pallas as pl
from jax.experimental.pallas import tpu as pltpu

_MIB = 1024 * 1024


def _round_up(a, b):
    return (a + b - 1) // b * b


def _vmem_capacity_bytes():
    """Per-core VMEM capacity; conservative (v7x-sized) fallback if the query is unavailable."""
    try:
        return int(pltpu.get_tpu_info().vmem_capacity_bytes)
    except Exception:
        return 64 * _MIB


def _const_spec(block_shape):
    """BlockSpec for an operand whose block index never changes across the grid.

    Single-buffered (pl.Buffered(1)): these operands are DMA'd once, so the default
    double-buffering would only waste VMEM (matters most on v7x's 64 MiB VMEM).
    """
    idx_map = lambda *_: (0,) * len(block_shape)
    try:
        return pl.BlockSpec(block_shape, idx_map, pipeline_mode=pl.Buffered(1))
    except (TypeError, AttributeError):  # older jax without pipeline_mode / Buffered
        return pl.BlockSpec(block_shape, idx_map)


# ---------------------------------------------------------------------------
# Kernels
# ---------------------------------------------------------------------------
def _prenorm_ffn_resident_kernel(x_ref, g_ref, b_ref, w1_ref, b1_ref, w2_ref, b2_ref,
                                 o_ref, *, eps, inv_dim):
    # x_ref: (tm, dim); g/b: (1, dim); w1: (dim, hidden); b1: (1, hidden);
    # w2: (hidden, dim); b2: (1, dim); o_ref: (tm, dim).
    x = x_ref[...].astype(jnp.float32)

    # One-pass LayerNorm: mean and E[x^2] reduced together, var = E[x^2] - mean^2.
    mean = jnp.sum(x, axis=-1, keepdims=True) * inv_dim
    ex2 = jnp.sum(x * x, axis=-1, keepdims=True) * inv_dim
    inv = jax.lax.rsqrt(ex2 - mean * mean + eps)
    xn = (x - mean) * inv * g_ref[...].astype(jnp.float32) + b_ref[...].astype(jnp.float32)

    # FeedForward: Linear -> SiLU -> Linear (Dropout p=0 elided).
    # MXU matmuls with bf16 operands (production default) and f32 accumulation.
    h = jnp.dot(xn.astype(w1_ref.dtype), w1_ref[...],
                preferred_element_type=jnp.float32) + b1_ref[...].astype(jnp.float32)
    h = h * jax.nn.sigmoid(h)                         # SiLU (EUP sigmoid, f32)
    out = jnp.dot(h.astype(w2_ref.dtype), w2_ref[...],
                  preferred_element_type=jnp.float32) + b2_ref[...].astype(jnp.float32)
    o_ref[...] = out.astype(o_ref.dtype)


def _prenorm_ffn_streamed_kernel(x_ref, g_ref, b_ref, w1_ref, b1_ref, w2_ref, b2_ref,
                                 o_ref, xn_ref, acc_ref, *, eps, inv_dim):
    # Hidden axis is streamed: w1 block (dim, th), w2 block (th, dim), b1 block (1, th).
    # xn_ref (tm, dim, matmul dtype) and acc_ref (tm, dim, f32) persist across hidden steps.
    h_idx = pl.program_id(1)

    @pl.when(h_idx == 0)
    def _():
        x = x_ref[...].astype(jnp.float32)
        mean = jnp.sum(x, axis=-1, keepdims=True) * inv_dim
        ex2 = jnp.sum(x * x, axis=-1, keepdims=True) * inv_dim
        inv = jax.lax.rsqrt(ex2 - mean * mean + eps)
        xn = (x - mean) * inv * g_ref[...].astype(jnp.float32) + b_ref[...].astype(jnp.float32)
        xn_ref[...] = xn.astype(xn_ref.dtype)
        acc_ref[...] = jnp.zeros_like(acc_ref)

    h = jnp.dot(xn_ref[...], w1_ref[...],
                preferred_element_type=jnp.float32) + b1_ref[...].astype(jnp.float32)
    h = h * jax.nn.sigmoid(h)
    acc_ref[...] += jnp.dot(h.astype(w2_ref.dtype), w2_ref[...],
                            preferred_element_type=jnp.float32)

    @pl.when(h_idx == pl.num_programs(1) - 1)
    def _():
        o_ref[...] = (acc_ref[...] + b2_ref[...].astype(jnp.float32)).astype(o_ref.dtype)


# ---------------------------------------------------------------------------
# Wrapper
# ---------------------------------------------------------------------------
def pre_norm_feed_forward(x, gamma, beta, w1, b1, w2, b2, *, eps=1e-5,
                          matmul_dtype=jnp.bfloat16, tm=None, th=None,
                          force_streamed=False):
    """PreNorm(dim, FeedForward) forward.

    x:     (batch, seq, dim)
    gamma: (dim,)   LayerNorm weight       beta: (dim,)  LayerNorm bias
    w1:    (dim, hidden)  first Linear weight, PRE-TRANSPOSED (in, out) layout
    b1:    (hidden,)
    w2:    (hidden, dim)  second Linear weight, PRE-TRANSPOSED (in, out) layout
    b2:    (dim,)
    matmul_dtype: dtype for matmul operands (bf16 default = fast MXU path); accumulation
                  is always f32.  Pass jnp.float32 for bit-accurate validation.
    """
    batch, seq, dim = x.shape
    hidden = w1.shape[1]
    M = batch * seq
    f32 = 4

    mm_dtype = jnp.dtype(matmul_dtype if matmul_dtype is not None else w1.dtype)
    # TODO(synk): store w1/w2 in mm_dtype at parameter creation to avoid the per-call cast.
    w1 = w1.astype(mm_dtype)
    w2 = w2.astype(mm_dtype)

    x_item = jnp.dtype(x.dtype).itemsize
    w_item = mm_dtype.itemsize
    capacity = _vmem_capacity_bytes()

    # ---- row tile: generation-aware fixed target, multiple of 8, rows padded to fit ----
    if tm is None:
        tm = 512 if capacity >= 100 * _MIB else 256     # v5e/v6e (128 MiB) : v7x (64 MiB)
    tm = max(8, (tm // 8) * 8)
    tm_eff = min(tm, _round_up(M, 8))
    m_padded = _round_up(M, tm_eff)

    # ---- choose plan: resident weights (single-buffered) vs streamed hidden axis ----
    resident_vmem = (
        2 * dim * hidden * w_item                       # W1 + W2, single-buffered
        + 2 * tm_eff * dim * 2 * x_item                 # double-buffered x / out tiles
        + tm_eff * hidden * (f32 + w_item)              # h (f32) + matmul-dtype copy
        + tm_eff * dim * (2 * f32 + w_item)             # xn / out intermediates
        + (3 * dim + hidden) * f32                      # gamma, beta, b1, b2
    )
    use_streamed = force_streamed or resident_vmem > int(0.75 * capacity)

    if use_streamed:
        if th is None or hidden % th != 0:
            th = next((c for c in (512, 256, 128) if hidden % c == 0), hidden)
        th_eff = min(th, hidden)
        needed = (
            2 * 2 * dim * th_eff * w_item               # double-buffered W1 / W2 chunks
            + 2 * tm_eff * dim * 2 * x_item             # x / out tiles
            + tm_eff * dim * (w_item + f32)             # xn scratch + f32 accumulator
            + tm_eff * th_eff * (f32 + w_item)          # h intermediate
            + (3 * dim + 2 * th_eff) * f32
        )
    else:
        th_eff = hidden
        needed = resident_vmem

    vmem_limit = int(max(16 * _MIB,
                         min(max(int(1.25 * needed), 32 * _MIB), capacity - 4 * _MIB)))

    # ---- operands ----
    x2d = x.reshape(M, dim)
    if m_padded != M:
        x2d = jnp.pad(x2d, ((0, m_padded - M), (0, 0)))
    g2d = gamma.reshape(1, dim)
    bt2d = beta.reshape(1, dim)
    b1_2d = b1.reshape(1, hidden)
    b2_2d = b2.reshape(1, dim)

    cost = pl.CostEstimate(
        flops=int(4 * m_padded * dim * hidden + 8 * m_padded * dim),
        transcendentals=int(m_padded * hidden + m_padded),
        bytes_accessed=int(2 * m_padded * dim * x_item + 2 * dim * hidden * w_item
                           + (3 * dim + hidden) * f32),
    )

    if not use_streamed:
        out = pl.pallas_call(
            functools.partial(_prenorm_ffn_resident_kernel, eps=eps, inv_dim=1.0 / dim),
            out_shape=jax.ShapeDtypeStruct((m_padded, dim), x.dtype),
            grid_spec=pltpu.PrefetchScalarGridSpec(
                num_scalar_prefetch=0,
                grid=(m_padded // tm_eff,),
                in_specs=[
                    pl.BlockSpec((tm_eff, dim), lambda i: (i, 0)),   # x tile (double-buffered)
                    _const_spec((1, dim)),                            # gamma
                    _const_spec((1, dim)),                            # beta
                    _const_spec((dim, hidden)),                       # W1 (in,out), resident
                    _const_spec((1, hidden)),                         # b1
                    _const_spec((hidden, dim)),                       # W2 (in,out), resident
                    _const_spec((1, dim)),                            # b2
                ],
                out_specs=pl.BlockSpec((tm_eff, dim), lambda i: (i, 0)),
            ),
            compiler_params=pltpu.CompilerParams(
                dimension_semantics=("parallel",),
                vmem_limit_bytes=vmem_limit,
            ),
            cost_estimate=cost,
        )(x2d, g2d, bt2d, w1, b1_2d, w2, b2_2d)
    else:
        out = pl.pallas_call(
            functools.partial(_prenorm_ffn_streamed_kernel, eps=eps, inv_dim=1.0 / dim),
            out_shape=jax.ShapeDtypeStruct((m_padded, dim), x.dtype),
            grid_spec=pltpu.PrefetchScalarGridSpec(
                num_scalar_prefetch=0,
                grid=(m_padded // tm_eff, hidden // th_eff),
                in_specs=[
                    pl.BlockSpec((tm_eff, dim), lambda i, h: (i, 0)),   # x tile (resident over h)
                    _const_spec((1, dim)),                               # gamma
                    _const_spec((1, dim)),                               # beta
                    pl.BlockSpec((dim, th_eff), lambda i, h: (0, h)),    # W1 chunk (streamed)
                    pl.BlockSpec((1, th_eff), lambda i, h: (0, h)),      # b1 chunk
                    pl.BlockSpec((th_eff, dim), lambda i, h: (h, 0)),    # W2 chunk (streamed)
                    _const_spec((1, dim)),                               # b2
                ],
                out_specs=pl.BlockSpec((tm_eff, dim), lambda i, h: (i, 0)),
                scratch_shapes=[
                    pltpu.VMEM((tm_eff, dim), mm_dtype),      # LN output (matmul operand dtype)
                    pltpu.VMEM((tm_eff, dim), jnp.float32),   # f32 accumulator over hidden chunks
                ],
            ),
            compiler_params=pltpu.CompilerParams(
                dimension_semantics=("parallel", "arbitrary"),
                vmem_limit_bytes=vmem_limit,
            ),
            cost_estimate=cost,
        )(x2d, g2d, bt2d, w1, b1_2d, w2, b2_2d)

    if m_padded != M:
        out = out[:M]
    return out.reshape(batch, seq, dim)


def pre_norm_feed_forward_ref(x, gamma, beta, w1, b1, w2, b2, eps=1e-5):
    mean = jnp.mean(x, axis=-1, keepdims=True)
    var = jnp.mean((x - mean) ** 2, axis=-1, keepdims=True)
    xn = (x - mean) * jax.lax.rsqrt(var + eps) * gamma + beta
    h = xn @ w1 + b1
    h = h * jax.nn.sigmoid(h)
    return h @ w2 + b2


if __name__ == "__main__":
    key = jax.random.PRNGKey(0)

    def make_params(k, dim, hidden):
        kg, kb, k1, k2, k3, k4 = jax.random.split(k, 6)
        gamma = 1.0 + 0.1 * jax.random.normal(kg, (dim,), dtype=jnp.float32)
        beta = 0.1 * jax.random.normal(kb, (dim,), dtype=jnp.float32)
        # Linear weights stored PRE-TRANSPOSED in (in, out) layout (== PyTorch weight.T).
        w1 = jax.random.normal(k1, (dim, hidden), dtype=jnp.float32) * 0.05
        b1 = jax.random.normal(k2, (hidden,), dtype=jnp.float32) * 0.05
        w2 = jax.random.normal(k3, (hidden, dim), dtype=jnp.float32) * 0.05
        b2 = jax.random.normal(k4, (dim,), dtype=jnp.float32) * 0.05
        return gamma, beta, w1, b1, w2, b2

    # --- small shape, resident-weights path, f32 matmul operands (tight check) ---
    batch, seq, dim, hidden = 2, 8, 32, 64
    kx, kp, key = jax.random.split(key, 3)
    x = jax.random.normal(kx, (batch, seq, dim), dtype=jnp.float32)
    params = make_params(kp, dim, hidden)

    out = pre_norm_feed_forward(x, *params, matmul_dtype=jnp.float32)
    jax.block_until_ready(out)
    ref = pre_norm_feed_forward_ref(x, *params)
    assert out.shape == (batch, seq, dim)
    assert jnp.allclose(out, ref, atol=1e-4, rtol=1e-4), "resident f32 mismatch vs reference"

    # --- same shape, production default (bf16 matmul operands, f32 accumulation) ---
    out_bf16 = pre_norm_feed_forward(x, *params)
    jax.block_until_ready(out_bf16)
    assert jnp.allclose(out_bf16, ref, atol=3e-2, rtol=3e-2), "resident bf16 mismatch"

    # --- streamed-hidden path (forced), lane-aligned dims, 2 hidden chunks ---
    batch2, seq2, dim2, hidden2 = 2, 8, 128, 256
    kx2, kp2, key = jax.random.split(key, 3)
    x2 = jax.random.normal(kx2, (batch2, seq2, dim2), dtype=jnp.float32)
    params2 = make_params(kp2, dim2, hidden2)
    out2 = pre_norm_feed_forward(x2, *params2, matmul_dtype=jnp.float32,
                                 force_streamed=True, th=128)
    jax.block_until_ready(out2)
    ref2 = pre_norm_feed_forward_ref(x2, *params2)
    assert jnp.allclose(out2, ref2, atol=1e-4, rtol=1e-4), "streamed f32 mismatch vs reference"

    print("KERNEL_OK")
</pallas_src>

<mosaic_0001>
module attributes {stable_mosaic.version = 11 : i64} {
  func.func @_prenorm_ffn_resident_kernel(%arg0: i32, %arg1: memref<16x32xf32, #tpu.memory_space<vmem>>, %arg2: memref<1x32xf32, #tpu.memory_space<vmem>>, %arg3: memref<1x32xf32, #tpu.memory_space<vmem>>, %arg4: memref<32x64xf32, #tpu.memory_space<vmem>>, %arg5: memref<1x64xf32, #tpu.memory_space<vmem>>, %arg6: memref<64x32xf32, #tpu.memory_space<vmem>>, %arg7: memref<1x32xf32, #tpu.memory_space<vmem>>, %arg8: memref<16x32xf32, #tpu.memory_space<vmem>>) attributes {dimension_semantics = [#tpu.dimension_semantics<parallel>], iteration_bounds = array<i64: 1>, scalar_prefetch = 0 : i64, scratch_operands = 0 : i64, tpu.core_type = #tpu.core_type<tc>, window_params = [{transform_indices = @transform_0, window_bounds = array<i64: 16, 32>}, {pipeline_mode = #tpu.pipeline_mode<synchronous>, transform_indices = @transform_1, window_bounds = array<i64: 1, 32>}, {pipeline_mode = #tpu.pipeline_mode<synchronous>, transform_indices = @transform_2, window_bounds = array<i64: 1, 32>}, {pipeline_mode = #tpu.pipeline_mode<synchronous>, transform_indices = @transform_3, window_bounds = array<i64: 32, 64>}, {pipeline_mode = #tpu.pipeline_mode<synchronous>, transform_indices = @transform_4, window_bounds = array<i64: 1, 64>}, {pipeline_mode = #tpu.pipeline_mode<synchronous>, transform_indices = @transform_5, window_bounds = array<i64: 64, 32>}, {pipeline_mode = #tpu.pipeline_mode<synchronous>, transform_indices = @transform_6, window_bounds = array<i64: 1, 32>}, {transform_indices = @transform_7, window_bounds = array<i64: 16, 32>}]} {
    %c0 = arith.constant 0 : index
    %c0_0 = arith.constant 0 : index
    %0 = vector.load %arg1[%c0, %c0_0] : memref<16x32xf32, #tpu.memory_space<vmem>>, vector<16x32xf32>
    %cst = arith.constant dense<0.000000e+00> : vector<16xf32>
    %1 = vector.multi_reduction <add>, %0, %cst [1] : vector<16x32xf32> to vector<16xf32>
    %2 = vector.shape_cast %1 : vector<16xf32> to vector<16x1xf32>
    %cst_1 = arith.constant 3.125000e-02 : f32
    %3 = vector.broadcast %cst_1 : f32 to vector<16x1xf32>
    %4 = arith.mulf %2, %3 : vector<16x1xf32>
    %5 = arith.mulf %0, %0 : vector<16x32xf32>
    %cst_2 = arith.constant dense<0.000000e+00> : vector<16xf32>
    %6 = vector.multi_reduction <add>, %5, %cst_2 [1] : vector<16x32xf32> to vector<16xf32>
    %7 = vector.shape_cast %6 : vector<16xf32> to vector<16x1xf32>
    %cst_3 = arith.constant 3.125000e-02 : f32
    %8 = vector.broadcast %cst_3 : f32 to vector<16x1xf32>
    %9 = arith.mulf %7, %8 : vector<16x1xf32>
    %10 = arith.mulf %4, %4 : vector<16x1xf32>
    %11 = arith.subf %9, %10 : vector<16x1xf32>
    %cst_4 = arith.constant 9.99999974E-6 : f32
    %12 = vector.broadcast %cst_4 : f32 to vector<16x1xf32>
    %13 = arith.addf %11, %12 : vector<16x1xf32>
    %14 = math.rsqrt %13 : vector<16x1xf32>
    %15 = vector.broadcast %4 : vector<16x1xf32> to vector<16x32xf32>
    %16 = arith.subf %0, %15 : vector<16x32xf32>
    %17 = vector.broadcast %14 : vector<16x1xf32> to vector<16x32xf32>
    %18 = arith.mulf %16, %17 : vector<16x32xf32>
    %c0_5 = arith.constant 0 : index
    %c0_6 = arith.constant 0 : index
    %19 = vector.load %arg2[%c0_5, %c0_6] : memref<1x32xf32, #tpu.memory_space<vmem>>, vector<1x32xf32>
    %20 = vector.broadcast %19 : vector<1x32xf32> to vector<16x32xf32>
    %21 = arith.mulf %18, %20 : vector<16x32xf32>
    %c0_7 = arith.constant 0 : index
    %c0_8 = arith.constant 0 : index
    %22 = vector.load %arg3[%c0_7, %c0_8] : memref<1x32xf32, #tpu.memory_space<vmem>>, vector<1x32xf32>
    %23 = vector.broadcast %22 : vector<1x32xf32> to vector<16x32xf32>
    %24 = arith.addf %21, %23 : vector<16x32xf32>
    %c0_9 = arith.constant 0 : index
    %c0_10 = arith.constant 0 : index
    %25 = vector.load %arg4[%c0_9, %c0_10] : memref<32x64xf32, #tpu.memory_space<vmem>>, vector<32x64xf32>
    %cst_11 = arith.constant dense<0.000000e+00> : vector<16x64xf32>
    %26 = tpu.matmul %24, %25, %cst_11 {dimension_numbers = #tpu.dot_dimension_numbers<[1], [0], [0], [1], [0, 0, 1, 1], [], []>} : vector<16x32xf32>, vector<32x64xf32>, vector<16x64xf32> -> vector<16x64xf32>
    %c0_12 = arith.constant 0 : index
    %c0_13 = arith.constant 0 : index
    %27 = vector.load %arg5[%c0_12, %c0_13] : memref<1x64xf32, #tpu.memory_space<vmem>>, vector<1x64xf32>
    %28 = vector.broadcast %27 : vector<1x64xf32> to vector<16x64xf32>
    %29 = arith.addf %26, %28 : vector<16x64xf32>
    %30 = arith.negf %29 : vector<16x64xf32>
    %31 = math.exp %30 : vector<16x64xf32>
    %cst_14 = arith.constant 1.000000e+00 : f32
    %32 = vector.broadcast %cst_14 : f32 to vector<16x64xf32>
    %33 = arith.addf %32, %31 : vector<16x64xf32>
    %34 = arith.divf %32, %33 : vector<16x64xf32>
    %35 = arith.mulf %29, %34 : vector<16x64xf32>
    %c0_15 = arith.constant 0 : index
    %c0_16 = arith.constant 0 : index
    %36 = vector.load %arg6[%c0_15, %c0_16] : memref<64x32xf32, #tpu.memory_space<vmem>>, vector<64x32xf32>
    %cst_17 = arith.constant dense<0.000000e+00> : vector<16x32xf32>
    %37 = tpu.matmul %35, %36, %cst_17 {dimension_numbers = #tpu.dot_dimension_numbers<[1], [0], [0], [1], [0, 0, 1, 1], [], []>} : vector<16x64xf32>, vector<64x32xf32>, vector<16x32xf32> -> vector<16x32xf32>
    %c0_18 = arith.constant 0 : index
    %c0_19 = arith.constant 0 : index
    %38 = vector.load %arg7[%c0_18, %c0_19] : memref<1x32xf32, #tpu.memory_space<vmem>>, vector<1x32xf32>
    %39 = vector.broadcast %38 : vector<1x32xf32> to vector<16x32xf32>
    %40 = arith.addf %37, %39 : vector<16x32xf32>
    %c0_20 = arith.constant 0 : index
    %c0_21 = arith.constant 0 : index
    %41 = vector.load %arg8[%c0_20, %c0_21] : memref<16x32xf32, #tpu.memory_space<vmem>>, vector<16x32xf32>
    tpu.vector_store %arg8[%c0_20, %c0_21], %40 {strides = array<i32>} : memref<16x32xf32, #tpu.memory_space<vmem>>, vector<16x32xf32>,
    return
  }
  func.func @transform_0(%arg0: i32) -> (i32, i32) {
    %c0_i32 = arith.constant 0 : i32
    %c0_i32_0 = arith.constant 0 : i32
    return %arg0, %c0_i32 : i32, i32
  }
  func.func @transform_1(%arg0: i32) -> (i32, i32) {
    %c0_i32 = arith.constant 0 : i32
    %c0_i32_0 = arith.constant 0 : i32
    %c0_i32_1 = arith.constant 0 : i32
    return %c0_i32, %c0_i32_0 : i32, i32
  }
  func.func @transform_2(%arg0: i32) -> (i32, i32) {
    %c0_i32 = arith.constant 0 : i32
    %c0_i32_0 = arith.constant 0 : i32
    %c0_i32_1 = arith.constant 0 : i32
    return %c0_i32, %c0_i32_0 : i32, i32
  }
  func.func @transform_3(%arg0: i32) -> (i32, i32) {
    %c0_i32 = arith.constant 0 : i32
    %c0_i32_0 = arith.constant 0 : i32
    %c0_i32_1 = arith.constant 0 : i32
    return %c0_i32, %c0_i32_0 : i32, i32
  }
  func.func @transform_4(%arg0: i32) -> (i32, i32) {
    %c0_i32 = arith.constant 0 : i32
    %c0_i32_0 = arith.constant 0 : i32
    %c0_i32_1 = arith.constant 0 : i32
    return %c0_i32, %c0_i32_0 : i32, i32
  }
  func.func @transform_5(%arg0: i32) -> (i32, i32) {
    %c0_i32 = arith.constant 0 : i32
    %c0_i32_0 = arith.constant 0 : i32
    %c0_i32_1 = arith.constant 0 : i32
    return %c0_i32, %c0_i32_0 : i32, i32
  }
  func.func @transform_6(%arg0: i32) -> (i32, i32) {
    %c0_i32 = arith.constant 0 : i32
    %c0_i32_0 = arith.constant 0 : i32
    %c0_i32_1 = arith.constant 0 : i32
    return %c0_i32, %c0_i32_0 : i32, i32
  }
  func.func @transform_7(%arg0: i32) -> (i32, i32) {
    %c0_i32 = arith.constant 0 : i32
    %c0_i32_0 = arith.constant 0 : i32
    return %arg0, %c0_i32 : i32, i32
  }
}

</mosaic_0001>

<bundles_post_ra>
// kernel: tpu_custom_call.1
= control target key start
LH: loop header
LB: loop body
LE: loop exit
PB: predicated region body
PF: predicated region fallthrough
CT: control target
= control target key end

     0   :  { %vm29_vm0 = vcmask 261120   ;;  %s535_s0 = inlined_call_operand.vmem [shape: f32[16,32], index: 0, kind: input, shape index: {}]   ;;  %s536_s1 = inlined_call_operand.vmem [shape: f32[1,32], index: 1, kind: input, shape index: {}]   ;;  %s537_s2 = inlined_call_operand.vmem [shape: f32[1,32], index: 2, kind: input, shape index: {}]   ;;  %s538_s3 = inlined_call_operand.vmem [shape: f32[32,64], index: 3, kind: input, shape index: {}]   ;;  %s539_s4 = inlined_call_operand.vmem [shape: f32[1,64], index: 4, kind: input, shape index: {}]   ;;  %s540_s5 = inlined_call_operand.vmem [shape: f32[64,32], index: 5, kind: input, shape index: {}]   ;;  %s541_s6 = inlined_call_operand.vmem [shape: f32[1,32], index: 6, kind: input, shape index: {}]   ;;  %s542_s7 = inlined_call_operand.hbm [shape: f32[16,32], index: 7, kind: output, shape index: {}]  }
   0x1   :  { %v27_v0 = vld [vmem:[%s535_s0] sm:$0xff]  ;;  %v28_v1 = vld [vmem:[%s535_s0 + $0x8] sm:$0xff] }
   0x2   :  { %12 = vsyncpa [#allocation3], 0  ;;  %v30_v2 = vsel %vm29_vm0, %v27_v0, 0.0  ;;  %v38_v3 = vmul.f32 %v27_v0, %v27_v0  ;;  %v39_v4 = vmul.f32 %v28_v1, %v28_v1  ;;  %v33_v6 = vsel %vm29_vm0, %v28_v1, 0.0  ;;  %v78_v8 = vld [vmem:[%s538_s3] sm:$0xff]  ;;  %v79_v9 = vld [vmem:[%s538_s3 + $0x8] sm:$0xff] }
   0x3   :  { %31 = vadd.xlane.f32.xlu0 %v30_v2  ;;  %v80_v10 = vld [vmem:[%s538_s3 + $0x10] sm:$0xff]  ;;  %v355_v11 = vpack.c.bf16 %v79_v9, %v78_v8  ;;  %v81_v12 = vld [vmem:[%s538_s3 + $0x18] sm:$0xff]  ;;  %v299_v30 = vld [vmem:[%s536_s1] ss:$0 sm:$0xff]  ;;  %vm199_vm1 = vcmask 523264   ;;  %s418_s30 = smov [#allocation2]  }
   0x4   :  { %v40_v5 = vsel %vm29_vm0, %v38_v3, 0.0  ;;  %v43_v7 = vsel %vm29_vm0, %v39_v4, 0.0  ;;  %v359_v13 = vpack.c.bf16 %v81_v12, %v80_v10  ;;  %v300_v32 = vld [vmem:[%s537_s2] ss:$0 sm:$0xff]  ;;  %v185_v41 = vld [vmem:[%s540_s5 + $0x8] sm:$0xff]  ;;  %v186_v43 = vld [vmem:[%s540_s5 + $0x10] sm:$0xff] }
   0x5   :  { %41 = vadd.xlane.f32.xlu1 %v40_v5  ;;  %356 = vmatprep.subr.bf16.mxu0 %v355_v11  ;;  %v184_v40 = vld [vmem:[%s540_s5] sm:$0xff]  ;;  %v187_v44 = vld [vmem:[%s540_s5 + $0x18] sm:$0xff]  ;;  %v189_v47 = vld [vmem:[%s540_s5 + $0x28] sm:$0xff]  ;;  %s288_s8 = sshll.u32 %s418_s30, 4  ;;  %s289_s8 = int_to_ptr.vmem [resolvable:$true] %s288_s8 }
   0x6   :  { %358 = vmatpush3.bf16.msra.mxu0 %v355_v11  ;;  %v363_v42 = vpack.c.bf16 %v185_v41, %v184_v40  ;;  %v367_v45 = vpack.c.bf16 %v187_v44, %v186_v43  ;;  %v188_v46 = vld [vmem:[%s540_s5 + $0x20] sm:$0xff]  ;;  %v190_v49 = vld [vmem:[%s540_s5 + $0x30] sm:$0xff]  ;;  %v191_v50 = vld [vmem:[%s540_s5 + $0x38] sm:$0xff]  ;;  %s394_s9 = scalar_lea.vmem %s289_s8, 256  ;;  %p399_p1 = scmp.lt.s32.totalorder %s289_s8, %s289_s8 }
   0x7   :  { %34 = vadd.xlane.f32.xlu0 %v33_v6  ;;  %360 = vmatprep.subr.bf16.mxu0 %v359_v13  ;;  %v371_v48 = vpack.c.bf16 %v189_v47, %v188_v46  ;;  %v375_v51 = vpack.c.bf16 %v191_v50, %v190_v49  ;;  %v301_v52 = vld [vmem:[%s539_s4] ss:$0 sm:$0xff]  ;;  %p395_p0 = scmp.ne.s32.totalorder %s289_s8, %s394_s9  ;;  %p400_p2 = scmp.lt.s32.totalorder %s394_s9, %s394_s9 }
   0x8   :  { %364 = vmatprep.subr.bf16.mxu1 %v363_v42  ;;  %v306_v3 = vld [vmem:[%s541_s6] ss:$0 sm:$0xff] }
   0x9   :  { %44 = vadd.xlane.f32.xlu1 %v43_v7  ;;  %366 = vmatpush3.bf16.msra.mxu1 %v363_v42  ;;  %p401_p3 = por %p400_p2, %p399_p1 }
   0xa   :  { %362 = vmatpush3.bf16.msra.mxu0 %v359_v13  ;;  %368 = vmatprep.subr.bf16.mxu1 %v367_v45 }
   0xb   :  { %p402_p4 = pnand %p401_p3, %p395_p0 }
   0xd   :  { %370 = vmatpush3.bf16.msra.mxu1 %v367_v45 }
   0xe   :  { %372 = vmatprep.subr.bf16.mxu1 %v371_v48 }
  0x11   :  { %374 = vmatpush3.bf16.msra.mxu1 %v371_v48 }
  0x12   :  { %376 = vmatprep.subr.bf16.mxu1 %v375_v51 }
  0x15   :  { %378 = vmatpush3.bf16.msra.mxu1 %v375_v51 }
  0x90   :  { %v32_v14 = vpop.xlane.xlu0 %31 }
  0x91   :  { %v36_v15 = vmul.f32 0.03125, %v32_v14 }
  0x92   :  { %v42_v16 = vpop.xlane.xlu1 %41 }
  0x93   :  { %v48_v17 = vmul.f32 %v36_v15, %v36_v15  ;;  %v46_v18 = vmul.f32 0.03125, %v42_v16  ;;  %v56_v28 = vsub.f32 %v27_v0, %v36_v15 }
  0x94   :  { %v35_v19 = vpop.xlane.xlu0 %34 }
  0x95   :  { %v50_v20 = vsub.f32 %v46_v18, %v48_v17  ;;  %v37_v21 = vmul.f32 0.03125, %v35_v19 }
  0x96   :  { %v45_v22 = vpop.xlane.xlu1 %44 }
  0x97   :  { %v52_v23 = vadd.f32 1e-05, %v50_v20  ;;  %v49_v24 = vmul.f32 %v37_v21, %v37_v21  ;;  %v47_v25 = vmul.f32 0.03125, %v45_v22  ;;  %v57_v33 = vsub.f32 %v28_v1, %v37_v21 }
  0x99   :  { %382 = vrsqrt.f32 %v52_v23  ;;  %v51_v26 = vsub.f32 %v47_v25, %v49_v24 }
  0x9b   :  { %v53_v27 = vadd.f32 1e-05, %v51_v26 }
  0x9d   :  { %384 = vrsqrt.f32 %v53_v27 }
  0xa3   :  { %v383_v29 = vpop.eup %382 }
  0xa4   :  { %v58_v31 = vmul.f32 %v383_v29, %v56_v28 }
  0xa6   :  { %v67_v34 = vmul.f32 %v299_v30, %v58_v31 }
  0xa7   :  { %v385_v35 = vpop.eup %384 }
  0xa8   :  { %v59_v36 = vmul.f32 %v385_v35, %v57_v33  ;;  %v76_v37 = vadd.f32 %v300_v32, %v67_v34 }
  0xaa   :  { %v68_v38 = vmul.f32 %v299_v30, %v59_v36  ;;  %333 = vmatprep.mubr.msk.f32.mxu0 %vm29_vm0, %v76_v37 }
  0xac   :  { %v77_v39 = vadd.f32 %v300_v32, %v68_v38 }
  0xae   :  { %334 = vmatmul.mubr.msk.f32.vlgmr.msra.gmra.mrb[0].mxu0 %vm29_vm0, %v77_v39 }
 0x181   :  { %v335_v53 = vpop.f32.mrb[0].mxu0 }
 0x182   :  { %v167_v54 = vadd.f32 %v335_v53, %v301_v52  ;;  %v161_v55 = vpop.f32.mrb[1].mxu0 }
 0x183   :  { %v162_v56 = vadd.f32 %v301_v52, %v161_v55 }
 0x184   :  { %v305_v57 = vmul.f32 -1.442695, %v167_v54 }
 0x185   :  { %v304_v58 = vmul.f32 -1.442695, %v162_v56 }
 0x186   :  { %386 = vpow2.f32 %v305_v57 }
 0x187   :  { %388 = vpow2.f32 %v304_v58 }
 0x190   :  { %v387_v59 = vpop.eup %386 }
 0x191   :  { %v389_v60 = vpop.eup %388  ;;  %v177_v61 = vadd.f32 1.0, %v387_v59 }
 0x192   :  { %v176_v62 = vadd.f32 1.0, %v389_v60 }
 0x193   :  { %390 = vrcp.f32 %v177_v61 }
 0x194   :  { %392 = vrcp.f32 %v176_v62 }
 0x19d   :  { %v391_v63 = vpop.eup %390 }
 0x19e   :  { %v393_v0 = vpop.eup %392  ;;  %v183_v2 = vmul.f32 %v391_v63, %v167_v54 }
 0x19f   :  { %v182_v1 = vmul.f32 %v393_v0, %v162_v56 }
 0x1a1   :  { %352 = vmatprep.mubr.msk.f32.mxu1 %vm199_vm1, %v182_v1 }
 0x1a2   :  { %353 = vmatmul.mubr.msk.f32.vlgmr.msra.gmra.mrb[0].mxu1 %vm199_vm1, %v183_v2 }
 0x275   :  { %v354_v4 = vpop.f32.mrb[0].mxu1 }
 0x276   :  { %v278_v5 = vadd.f32 %v354_v4, %v306_v3  ;;  %v272_v6 = vpop.f32.mrb[1].mxu1 }
 0x277   :  { %v273_v7 = vadd.f32 %v306_v3, %v272_v6 }
 0x278   :  { %282 = vst.msk [vmem:[#allocation2 + $0x8] sm:$0xff] %vm29_vm0, %v278_v5 }
 0x279   :  { %281 = vst.msk [vmem:[#allocation2] sm:$0xff] %vm29_vm0, %v273_v7 }
 0x27a   :  { %405 = shalt.err (!%p402_p4)
}
 0x27b   :  { %s406_s11 = scalar_lea.hbm %s542_s7, 256 }
 0x27c   :  { %p407_p5 = scmp.ne.s32.totalorder %s542_s7, %s406_s11  ;;  %p410_p6 = scmp.lt.u32.totalorder %s406_s11, %s542_s7 }
 0x27e   :  { %p412_p7 = pnand %p410_p6, %p407_p5 }
 0x280   :  { %415 = shalt.err (!%p412_p7)
}
 0x281   :  { %s419_s15 = smov 128   ;;  %s420_s16 = smov 8  }
 0x282   :  { %294 = dma.vmem_to_hbm [thread:$0]  %s289_s8, 256, %s542_s7, [#allocation3], %s419_s15, %s419_s15, %s420_s16  }
 0x283   :  { %416 = dma.done.wait [#allocation3], 256  }
 0x284   :  { %417 = vsyncadd [#allocation3], 4294967040 }
 0x285   :  { %298 = vsyncpa [#allocation3], 1 }

</bundles_post_ra>
